<compile_context>
chip_gen: v6e
topology: v6e:2x2x1
jax: 0.10.0
libtpu: 0.0.40
codegen_flags: <defaults>
</compile_context>

<pallas_src>
import functools

import jax
import jax.numpy as jnp
import numpy as np
from jax.experimental import pallas as pl
from jax.experimental.pallas import tpu as pltpu


def _fused_double_conv_kernel(H, W, NB, x_ref, masks_ref,
                              taps_a_ref, pw_a_ref,
                              taps_b_ref, pw_b_ref,
                              o_ref):
    """Fused (ultra_one + BatchNorm + ReLU) x2 for NB batch images.

    x_ref:      (NB, Cin, HW)   input, NCHW with H,W flattened onto lanes
    masks_ref:  (4, HW) f32     {0,1} in-bounds masks [up, down, left, right]
    taps_*_ref: (C, 6)          [w1 | w2] depthwise taps (w1[c,kh], w2[c,kw])
    pw_*_ref:   (Cout, C+1)     [BN-scale-folded pointwise weight | BN bias]
    o_ref:      (NB, Cout, HW)
    """
    HW = H * W
    cin = taps_a_ref.shape[0]
    cout = taps_b_ref.shape[0]

    # Masks were precomputed in the wrapper (hoisted iota / %W / casts) and are
    # DMA'd once (constant index_map).  jnp.where keeps non-finite border
    # values from producing NaN (vs. mask-multiply).
    masks = masks_ref[...] != 0.0                    # (4, HW) bool
    m_up, m_down = masks[0:1], masks[1:2]
    m_left, m_right = masks[2:3], masks[3:4]

    # Flat-axis shift amounts for the +-1 row / +-1 col neighbours.
    s_up = W % HW
    s_down = (HW - W) % HW
    s_left = 1 % HW
    s_right = (HW - 1) % HW

    taps_a = taps_a_ref[...]
    taps_b = taps_b_ref[...]
    pw_a = pw_a_ref[...]
    pw_b = pw_b_ref[...]

    def ultra_bn_relu(u, taps, pw_and_b, c_in):
        w1 = taps[:, 0:3]                            # vertical taps
        w2 = taps[:, 3:6]                            # horizontal taps
        # depthwise (3,1), zero-padded by 1 along H (+-W shifts on flat axis)
        up = jnp.where(m_up, pltpu.roll(u, s_up, axis=1), 0.0)
        down = jnp.where(m_down, pltpu.roll(u, s_down, axis=1), 0.0)
        y = w1[:, 0:1] * up + w1[:, 1:2] * u + w1[:, 2:3] * down
        # depthwise (1,3), zero-padded by 1 along W (+-1 shifts, masked at row wrap)
        left = jnp.where(m_left, pltpu.roll(y, s_left, axis=1), 0.0)
        right = jnp.where(m_right, pltpu.roll(y, s_right, axis=1), 0.0)
        z = w2[:, 0:1] * left + w2[:, 1:2] * y + w2[:, 2:3] * right
        # pointwise 1x1 (BN scale pre-folded) on the MXU, + BN bias + ReLU.
        wp = pw_and_b[:, :c_in]                      # (Cout, C_in)
        b = pw_and_b[:, c_in:c_in + 1]               # (Cout, 1)
        acc = jnp.dot(wp, z, preferred_element_type=jnp.float32)
        return jnp.maximum(acc + b, 0.0)

    # Unrolled loop over the NB images of this block (per-image work identical).
    for nb in range(NB):
        u = x_ref[nb].astype(jnp.float32)            # (Cin, HW)
        h1 = ultra_bn_relu(u, taps_a, pw_a, cin)     # (Cout, HW)
        h2 = ultra_bn_relu(h1, taps_b, pw_b, cout)   # (Cout, HW)
        o_ref[nb] = h2.astype(o_ref.dtype)


def one_double_conv(x_nchw, params, *, target_block_bytes=1 << 20):
    """Full One_DoubleConv forward.

    x_nchw: (N, Cin, H, W) float32 (PyTorch layout).
    params: ((w1a, w2a, wpa, scale_a, bias_a), (w1b, w2b, wpb, scale_b, bias_b))
            with w1/w2: (3, C), wp: (Cin, Cout), scale/bias: (Cout,)
    Returns (N, Cout, H, W).
    """
    N, Cin, H, W = x_nchw.shape
    (w1a, w2a, wpa, sa, ba), (w1b, w2b, wpb, sb, bb) = params
    Cout = wpa.shape[1]
    HW = H * W

    # Free reshape for contiguous NCHW: H*W lands on the 128-lane axis.
    x = x_nchw.reshape(N, Cin, HW)

    # Pack weights into a few slabs (fewer micro-DMAs).  BN scale is folded
    # into the pointwise weight; only the bias is applied in-kernel.
    taps_a = jnp.concatenate([w1a.T, w2a.T], axis=1)                    # (Cin, 6)
    taps_b = jnp.concatenate([w1b.T, w2b.T], axis=1)                    # (Cout, 6)
    pw_a = jnp.concatenate([(wpa * sa[None, :]).T, ba.reshape(Cout, 1)], axis=1)  # (Cout, Cin+1)
    pw_b = jnp.concatenate([(wpb * sb[None, :]).T, bb.reshape(Cout, 1)], axis=1)  # (Cout, Cout+1)

    # Hoisted boundary masks for the flattened H*W lane axis (built once here,
    # DMA'd once into the kernel).
    idx = jnp.arange(HW, dtype=jnp.int32)
    col = idx % W
    masks = jnp.stack([idx >= W,                 # p - W stays in-bounds (up)
                       idx < (H - 1) * W,        # p + W stays in-bounds (down)
                       col > 0,                  # p - 1 same row (left)
                       col < W - 1,              # p + 1 same row (right)
                       ]).astype(jnp.float32)    # (4, HW)

    itemsize = x.dtype.itemsize

    # Physical VMEM with headroom for Mosaic internal scratch (v7x has only
    # 64 MiB per TensorCore, so never request the full amount).
    try:
        phys_vmem = pltpu.get_tpu_info().vmem_capacity_bytes
    except Exception:
        phys_vmem = 64 << 20
    vmem_cap = int(phys_vmem * 0.7)

    per_image_bytes = itemsize * HW * (Cin + Cout)
    tmp_bytes = itemsize * HW * max(Cin, Cout) * 16      # in-kernel temporaries

    # Images per grid step: big enough to amortize per-step grid/DMA overhead,
    # small enough for double-buffered blocks to fit VMEM, and keep >= 2 grid
    # steps when N >= 2 so both v7x TensorCores are fed.  NB divides N so there
    # are no padded partial blocks.
    nb = max(1, min(N, target_block_bytes // max(per_image_bytes, 1)))
    max_nb_vmem = max(1, (vmem_cap - 2 * tmp_bytes) // max(4 * per_image_bytes, 1))
    nb = max(1, min(nb, max_nb_vmem))
    if N >= 2:
        nb = min(nb, (N + 1) // 2)
    while N % nb != 0:
        nb -= 1
    num_steps = N // nb

    block_bytes = itemsize * nb * HW * (Cin + Cout)
    const_bytes = itemsize * (4 * HW + 6 * (Cin + Cout) + Cout * (Cin + Cout + 2))
    vmem_limit = int(min(vmem_cap,
                         max(16 << 20,
                             4 * block_bytes + 2 * tmp_bytes + 2 * const_bytes)))

    # Advisory cost for XLA's scheduler around the custom call.
    flops = int(N * HW * (10 * Cin + 2 * Cin * Cout
                          + 10 * Cout + 2 * Cout * Cout + 4 * Cout))
    bytes_accessed = int(itemsize * (N * HW * (Cin + Cout)) + const_bytes)
    cost = pl.CostEstimate(flops=flops, transcendentals=0,
                           bytes_accessed=bytes_accessed)

    kernel = functools.partial(_fused_double_conv_kernel, H, W, nb)

    # TODO(synk): for very large H*W add an H-tile grid axis (2-row halo per
    # side, since two vertical 3-tap convs are chained) so blocks always fit
    # v7x's 64 MiB VMEM and pipeline; whole-image blocks are fine at these shapes.
    # TODO(synk): optional bf16 storage / depthwise math for v6e/v7x (keep the
    # MXU pointwise accumulation in f32); kept f32 here to match the PyTorch
    # reference numerics and to stay fast on v5e (no bf16 VPU).
    out = pl.pallas_call(
        kernel,
        out_shape=jax.ShapeDtypeStruct((N, Cout, HW), x.dtype),
        grid=(num_steps,),
        in_specs=[
            pl.BlockSpec((nb, Cin, HW), lambda n: (n, 0, 0)),
            pl.BlockSpec((4, HW), lambda n: (0, 0)),
            pl.BlockSpec((Cin, 6), lambda n: (0, 0)),
            pl.BlockSpec((Cout, Cin + 1), lambda n: (0, 0)),
            pl.BlockSpec((Cout, 6), lambda n: (0, 0)),
            pl.BlockSpec((Cout, Cout + 1), lambda n: (0, 0)),
        ],
        out_specs=pl.BlockSpec((nb, Cout, HW), lambda n: (n, 0, 0)),
        compiler_params=pltpu.CompilerParams(
            dimension_semantics=("parallel",),
            vmem_limit_bytes=vmem_limit),
        cost_estimate=cost,
    )(x, masks, taps_a, pw_a, taps_b, pw_b)

    return out.reshape(N, Cout, H, W)                # free reshape back to NCHW


# ------------------------- pure-JAX reference (same math) -------------------
def _ref_block(x, w1, w2, wp, scale, bias):
    # x: NHWC.  w1/w2: (3, C), wp: (Cin, Cout), scale/bias: (Cout,)
    zrow = jnp.zeros_like(x[:, :1])
    y = (w1[0] * jnp.concatenate([zrow, x[:, :-1]], axis=1)
         + w1[1] * x
         + w1[2] * jnp.concatenate([x[:, 1:], zrow], axis=1))
    zcol = jnp.zeros_like(y[:, :, :1])
    z = (w2[0] * jnp.concatenate([zcol, y[:, :, :-1]], axis=2)
         + w2[1] * y
         + w2[2] * jnp.concatenate([y[:, :, 1:], zcol], axis=2))
    out = jnp.einsum("nhwc,cd->nhwd", z, wp) * scale + bias
    return jnp.maximum(out, 0.0)


def _ref_forward(x_nchw, params):
    x = jnp.transpose(x_nchw, (0, 2, 3, 1))
    for (w1, w2, wp, s, b) in params:
        x = _ref_block(x, w1, w2, wp, s, b)
    return jnp.transpose(x, (0, 3, 1, 2))


def _init_block_params(key, cin, cout, eps=1e-5):
    k1, k2, k3, k4, k5 = jax.random.split(key, 5)
    w1 = jax.random.normal(k1, (3, cin), jnp.float32) * 0.3     # conv1 (3,1) depthwise
    w2 = jax.random.normal(k2, (3, cin), jnp.float32) * 0.3     # conv2 (1,3) depthwise
    wp = jax.random.normal(k3, (cin, cout), jnp.float32) * 0.3  # pointwise 1x1
    gamma = 1.0 + 0.1 * jax.random.normal(k4, (cout,), jnp.float32)
    beta = 0.1 * jax.random.normal(k5, (cout,), jnp.float32)
    running_mean = jnp.zeros((cout,), jnp.float32)
    running_var = jnp.ones((cout,), jnp.float32)
    scale = gamma / jnp.sqrt(running_var + eps)   # inference-mode BatchNorm
    bias = beta - running_mean * scale
    return (w1, w2, wp, scale, bias)


if __name__ == "__main__":
    key = jax.random.PRNGKey(0)
    kx, kp1, kp2 = jax.random.split(key, 3)

    N, in_ch, out_ch, H, W = 2, 4, 8, 16, 16
    x = jax.random.normal(kx, (N, in_ch, H, W), jnp.float32)    # NCHW, like PyTorch

    params = (
        _init_block_params(kp1, in_ch, out_ch),    # ultra_one(in_ch, out_ch) + BN + ReLU
        _init_block_params(kp2, out_ch, out_ch),   # ultra_one(out_ch, out_ch) + BN + ReLU
    )

    out = jax.block_until_ready(one_double_conv(x, params))
    ref = jax.block_until_ready(_ref_forward(x, params))

    assert out.shape == (N, out_ch, H, W), out.shape
    np.testing.assert_allclose(np.asarray(out), np.asarray(ref),
                               rtol=1e-4, atol=1e-4)
    print("KERNEL_OK")
</pallas_src>

<mosaic_0001>
module attributes {stable_mosaic.version = 11 : i64} {
  func.func @_fused_double_conv_kernel(%arg0: i32, %arg1: memref<1x4x256xf32, #tpu.memory_space<vmem>>, %arg2: memref<4x256xf32, #tpu.memory_space<vmem>>, %arg3: memref<4x6xf32, #tpu.memory_space<vmem>>, %arg4: memref<8x5xf32, #tpu.memory_space<vmem>>, %arg5: memref<8x6xf32, #tpu.memory_space<vmem>>, %arg6: memref<8x9xf32, #tpu.memory_space<vmem>>, %arg7: memref<1x8x256xf32, #tpu.memory_space<vmem>>) attributes {dimension_semantics = [#tpu.dimension_semantics<parallel>], iteration_bounds = array<i64: 2>, scalar_prefetch = 0 : i64, scratch_operands = 0 : i64, tpu.core_type = #tpu.core_type<tc>, window_params = [{transform_indices = @transform_0, window_bounds = array<i64: 1, 4, 256>}, {pipeline_mode = #tpu.pipeline_mode<synchronous>, transform_indices = @transform_1, window_bounds = array<i64: 4, 256>}, {pipeline_mode = #tpu.pipeline_mode<synchronous>, transform_indices = @transform_2, window_bounds = array<i64: 4, 6>}, {pipeline_mode = #tpu.pipeline_mode<synchronous>, transform_indices = @transform_3, window_bounds = array<i64: 8, 5>}, {pipeline_mode = #tpu.pipeline_mode<synchronous>, transform_indices = @transform_4, window_bounds = array<i64: 8, 6>}, {pipeline_mode = #tpu.pipeline_mode<synchronous>, transform_indices = @transform_5, window_bounds = array<i64: 8, 9>}, {transform_indices = @transform_6, window_bounds = array<i64: 1, 8, 256>}]} {
    %c0 = arith.constant 0 : index
    %c0_0 = arith.constant 0 : index
    %0 = vector.load %arg2[%c0, %c0_0] : memref<4x256xf32, #tpu.memory_space<vmem>>, vector<4x256xf32>
    %cst = arith.constant 0.000000e+00 : f32
    %1 = vector.broadcast %cst : f32 to vector<4x256xf32>
    %2 = arith.cmpf one, %0, %1 : vector<4x256xf32>
    %3 = vector.extract_strided_slice %2 {offsets = [0, 0], sizes = [1, 256], strides = [1, 1]} : vector<4x256xi1> to vector<1x256xi1>
    %4 = vector.extract_strided_slice %2 {offsets = [1, 0], sizes = [1, 256], strides = [1, 1]} : vector<4x256xi1> to vector<1x256xi1>
    %5 = vector.extract_strided_slice %2 {offsets = [2, 0], sizes = [1, 256], strides = [1, 1]} : vector<4x256xi1> to vector<1x256xi1>
    %6 = vector.extract_strided_slice %2 {offsets = [3, 0], sizes = [1, 256], strides = [1, 1]} : vector<4x256xi1> to vector<1x256xi1>
    %c0_1 = arith.constant 0 : index
    %c0_2 = arith.constant 0 : index
    %7 = vector.load %arg3[%c0_1, %c0_2] : memref<4x6xf32, #tpu.memory_space<vmem>>, vector<4x6xf32>
    %c0_3 = arith.constant 0 : index
    %c0_4 = arith.constant 0 : index
    %8 = vector.load %arg5[%c0_3, %c0_4] : memref<8x6xf32, #tpu.memory_space<vmem>>, vector<8x6xf32>
    %c0_5 = arith.constant 0 : index
    %c0_6 = arith.constant 0 : index
    %9 = vector.load %arg4[%c0_5, %c0_6] : memref<8x5xf32, #tpu.memory_space<vmem>>, vector<8x5xf32>
    %c0_7 = arith.constant 0 : index
    %c0_8 = arith.constant 0 : index
    %10 = vector.load %arg6[%c0_7, %c0_8] : memref<8x9xf32, #tpu.memory_space<vmem>>, vector<8x9xf32>
    %c0_9 = arith.constant 0 : index
    %c0_10 = arith.constant 0 : index
    %c0_11 = arith.constant 0 : index
    %11 = vector.load %arg1[%c0_9, %c0_10, %c0_11] : memref<1x4x256xf32, #tpu.memory_space<vmem>>, vector<1x4x256xf32>
    %12 = vector.shape_cast %11 : vector<1x4x256xf32> to vector<4x256xf32>
    %13 = vector.extract_strided_slice %7 {offsets = [0, 0], sizes = [4, 3], strides = [1, 1]} : vector<4x6xf32> to vector<4x3xf32>
    %14 = vector.extract_strided_slice %7 {offsets = [0, 3], sizes = [4, 3], strides = [1, 1]} : vector<4x6xf32> to vector<4x3xf32>
    %c16_i32 = arith.constant 16 : i32
    %15 = tpu.dynamic_rotate %12 by %c16_i32 dim 1 : vector<4x256xf32>, i32 -> vector<4x256xf32>
    %cst_12 = arith.constant 0.000000e+00 : f32
    %16 = vector.shape_cast %3 : vector<1x256xi1> to vector<1x256xi1>
    %17 = vector.broadcast %16 : vector<1x256xi1> to vector<4x256xi1>
    %18 = vector.broadcast %cst_12 : f32 to vector<4x256xf32>
    %19 = arith.select %17, %15, %18 : vector<4x256xi1>, vector<4x256xf32>
    %c240_i32 = arith.constant 240 : i32
    %20 = tpu.dynamic_rotate %12 by %c240_i32 dim 1 : vector<4x256xf32>, i32 -> vector<4x256xf32>
    %cst_13 = arith.constant 0.000000e+00 : f32
    %21 = vector.shape_cast %4 : vector<1x256xi1> to vector<1x256xi1>
    %22 = vector.broadcast %21 : vector<1x256xi1> to vector<4x256xi1>
    %23 = vector.broadcast %cst_13 : f32 to vector<4x256xf32>
    %24 = arith.select %22, %20, %23 : vector<4x256xi1>, vector<4x256xf32>
    %25 = vector.extract_strided_slice %13 {offsets = [0, 0], sizes = [4, 1], strides = [1, 1]} : vector<4x3xf32> to vector<4x1xf32>
    %26 = vector.broadcast %25 : vector<4x1xf32> to vector<4x256xf32>
    %27 = arith.mulf %26, %19 : vector<4x256xf32>
    %28 = vector.extract_strided_slice %13 {offsets = [0, 1], sizes = [4, 1], strides = [1, 1]} : vector<4x3xf32> to vector<4x1xf32>
    %29 = vector.broadcast %28 : vector<4x1xf32> to vector<4x256xf32>
    %30 = arith.mulf %29, %12 : vector<4x256xf32>
    %31 = arith.addf %27, %30 : vector<4x256xf32>
    %32 = vector.extract_strided_slice %13 {offsets = [0, 2], sizes = [4, 1], strides = [1, 1]} : vector<4x3xf32> to vector<4x1xf32>
    %33 = vector.broadcast %32 : vector<4x1xf32> to vector<4x256xf32>
    %34 = arith.mulf %33, %24 : vector<4x256xf32>
    %35 = arith.addf %31, %34 : vector<4x256xf32>
    %c1_i32 = arith.constant 1 : i32
    %36 = tpu.dynamic_rotate %35 by %c1_i32 dim 1 : vector<4x256xf32>, i32 -> vector<4x256xf32>
    %cst_14 = arith.constant 0.000000e+00 : f32
    %37 = vector.shape_cast %5 : vector<1x256xi1> to vector<1x256xi1>
    %38 = vector.broadcast %37 : vector<1x256xi1> to vector<4x256xi1>
    %39 = vector.broadcast %cst_14 : f32 to vector<4x256xf32>
    %40 = arith.select %38, %36, %39 : vector<4x256xi1>, vector<4x256xf32>
    %c255_i32 = arith.constant 255 : i32
    %41 = tpu.dynamic_rotate %35 by %c255_i32 dim 1 : vector<4x256xf32>, i32 -> vector<4x256xf32>
    %cst_15 = arith.constant 0.000000e+00 : f32
    %42 = vector.shape_cast %6 : vector<1x256xi1> to vector<1x256xi1>
    %43 = vector.broadcast %42 : vector<1x256xi1> to vector<4x256xi1>
    %44 = vector.broadcast %cst_15 : f32 to vector<4x256xf32>
    %45 = arith.select %43, %41, %44 : vector<4x256xi1>, vector<4x256xf32>
    %46 = vector.extract_strided_slice %14 {offsets = [0, 0], sizes = [4, 1], strides = [1, 1]} : vector<4x3xf32> to vector<4x1xf32>
    %47 = vector.broadcast %46 : vector<4x1xf32> to vector<4x256xf32>
    %48 = arith.mulf %47, %40 : vector<4x256xf32>
    %49 = vector.extract_strided_slice %14 {offsets = [0, 1], sizes = [4, 1], strides = [1, 1]} : vector<4x3xf32> to vector<4x1xf32>
    %50 = vector.broadcast %49 : vector<4x1xf32> to vector<4x256xf32>
    %51 = arith.mulf %50, %35 : vector<4x256xf32>
    %52 = arith.addf %48, %51 : vector<4x256xf32>
    %53 = vector.extract_strided_slice %14 {offsets = [0, 2], sizes = [4, 1], strides = [1, 1]} : vector<4x3xf32> to vector<4x1xf32>
    %54 = vector.broadcast %53 : vector<4x1xf32> to vector<4x256xf32>
    %55 = arith.mulf %54, %45 : vector<4x256xf32>
    %56 = arith.addf %52, %55 : vector<4x256xf32>
    %57 = vector.extract_strided_slice %9 {offsets = [0, 0], sizes = [8, 4], strides = [1, 1]} : vector<8x5xf32> to vector<8x4xf32>
    %58 = vector.extract_strided_slice %9 {offsets = [0, 4], sizes = [8, 1], strides = [1, 1]} : vector<8x5xf32> to vector<8x1xf32>
    %cst_16 = arith.constant dense<0.000000e+00> : vector<8x256xf32>
    %59 = tpu.matmul %57, %56, %cst_16 {dimension_numbers = #tpu.dot_dimension_numbers<[1], [0], [0], [1], [0, 0, 1, 1], [], []>} : vector<8x4xf32>, vector<4x256xf32>, vector<8x256xf32> -> vector<8x256xf32>
    %60 = vector.broadcast %58 : vector<8x1xf32> to vector<8x256xf32>
    %61 = arith.addf %59, %60 : vector<8x256xf32>
    %cst_17 = arith.constant 0.000000e+00 : f32
    %62 = vector.broadcast %cst_17 : f32 to vector<8x256xf32>
    %63 = arith.maximumf %61, %62 : vector<8x256xf32>
    %64 = vector.extract_strided_slice %8 {offsets = [0, 0], sizes = [8, 3], strides = [1, 1]} : vector<8x6xf32> to vector<8x3xf32>
    %65 = vector.extract_strided_slice %8 {offsets = [0, 3], sizes = [8, 3], strides = [1, 1]} : vector<8x6xf32> to vector<8x3xf32>
    %c16_i32_18 = arith.constant 16 : i32
    %66 = tpu.dynamic_rotate %63 by %c16_i32_18 dim 1 : vector<8x256xf32>, i32 -> vector<8x256xf32>
    %cst_19 = arith.constant 0.000000e+00 : f32
    %67 = vector.shape_cast %3 : vector<1x256xi1> to vector<1x256xi1>
    %68 = vector.broadcast %67 : vector<1x256xi1> to vector<8x256xi1>
    %69 = vector.broadcast %cst_19 : f32 to vector<8x256xf32>
    %70 = arith.select %68, %66, %69 : vector<8x256xi1>, vector<8x256xf32>
    %c240_i32_20 = arith.constant 240 : i32
    %71 = tpu.dynamic_rotate %63 by %c240_i32_20 dim 1 : vector<8x256xf32>, i32 -> vector<8x256xf32>
    %cst_21 = arith.constant 0.000000e+00 : f32
    %72 = vector.shape_cast %4 : vector<1x256xi1> to vector<1x256xi1>
    %73 = vector.broadcast %72 : vector<1x256xi1> to vector<8x256xi1>
    %74 = vector.broadcast %cst_21 : f32 to vector<8x256xf32>
    %75 = arith.select %73, %71, %74 : vector<8x256xi1>, vector<8x256xf32>
    %76 = vector.extract_strided_slice %64 {offsets = [0, 0], sizes = [8, 1], strides = [1, 1]} : vector<8x3xf32> to vector<8x1xf32>
    %77 = vector.broadcast %76 : vector<8x1xf32> to vector<8x256xf32>
    %78 = arith.mulf %77, %70 : vector<8x256xf32>
    %79 = vector.extract_strided_slice %64 {offsets = [0, 1], sizes = [8, 1], strides = [1, 1]} : vector<8x3xf32> to vector<8x1xf32>
    %80 = vector.broadcast %79 : vector<8x1xf32> to vector<8x256xf32>
    %81 = arith.mulf %80, %63 : vector<8x256xf32>
    %82 = arith.addf %78, %81 : vector<8x256xf32>
    %83 = vector.extract_strided_slice %64 {offsets = [0, 2], sizes = [8, 1], strides = [1, 1]} : vector<8x3xf32> to vector<8x1xf32>
    %84 = vector.broadcast %83 : vector<8x1xf32> to vector<8x256xf32>
    %85 = arith.mulf %84, %75 : vector<8x256xf32>
    %86 = arith.addf %82, %85 : vector<8x256xf32>
    %c1_i32_22 = arith.constant 1 : i32
    %87 = tpu.dynamic_rotate %86 by %c1_i32_22 dim 1 : vector<8x256xf32>, i32 -> vector<8x256xf32>
    %cst_23 = arith.constant 0.000000e+00 : f32
    %88 = vector.shape_cast %5 : vector<1x256xi1> to vector<1x256xi1>
    %89 = vector.broadcast %88 : vector<1x256xi1> to vector<8x256xi1>
    %90 = vector.broadcast %cst_23 : f32 to vector<8x256xf32>
    %91 = arith.select %89, %87, %90 : vector<8x256xi1>, vector<8x256xf32>
    %c255_i32_24 = arith.constant 255 : i32
    %92 = tpu.dynamic_rotate %86 by %c255_i32_24 dim 1 : vector<8x256xf32>, i32 -> vector<8x256xf32>
    %cst_25 = arith.constant 0.000000e+00 : f32
    %93 = vector.shape_cast %6 : vector<1x256xi1> to vector<1x256xi1>
    %94 = vector.broadcast %93 : vector<1x256xi1> to vector<8x256xi1>
    %95 = vector.broadcast %cst_25 : f32 to vector<8x256xf32>
    %96 = arith.select %94, %92, %95 : vector<8x256xi1>, vector<8x256xf32>
    %97 = vector.extract_strided_slice %65 {offsets = [0, 0], sizes = [8, 1], strides = [1, 1]} : vector<8x3xf32> to vector<8x1xf32>
    %98 = vector.broadcast %97 : vector<8x1xf32> to vector<8x256xf32>
    %99 = arith.mulf %98, %91 : vector<8x256xf32>
    %100 = vector.extract_strided_slice %65 {offsets = [0, 1], sizes = [8, 1], strides = [1, 1]} : vector<8x3xf32> to vector<8x1xf32>
    %101 = vector.broadcast %100 : vector<8x1xf32> to vector<8x256xf32>
    %102 = arith.mulf %101, %86 : vector<8x256xf32>
    %103 = arith.addf %99, %102 : vector<8x256xf32>
    %104 = vector.extract_strided_slice %65 {offsets = [0, 2], sizes = [8, 1], strides = [1, 1]} : vector<8x3xf32> to vector<8x1xf32>
    %105 = vector.broadcast %104 : vector<8x1xf32> to vector<8x256xf32>
    %106 = arith.mulf %105, %96 : vector<8x256xf32>
    %107 = arith.addf %103, %106 : vector<8x256xf32>
    %108 = vector.extract_strided_slice %10 {offsets = [0, 0], sizes = [8, 8], strides = [1, 1]} : vector<8x9xf32> to vector<8x8xf32>
    %109 = vector.extract_strided_slice %10 {offsets = [0, 8], sizes = [8, 1], strides = [1, 1]} : vector<8x9xf32> to vector<8x1xf32>
    %cst_26 = arith.constant dense<0.000000e+00> : vector<8x256xf32>
    %110 = tpu.matmul %108, %107, %cst_26 {dimension_numbers = #tpu.dot_dimension_numbers<[1], [0], [0], [1], [0, 0, 1, 1], [], []>} : vector<8x8xf32>, vector<8x256xf32>, vector<8x256xf32> -> vector<8x256xf32>
    %111 = vector.broadcast %109 : vector<8x1xf32> to vector<8x256xf32>
    %112 = arith.addf %110, %111 : vector<8x256xf32>
    %cst_27 = arith.constant 0.000000e+00 : f32
    %113 = vector.broadcast %cst_27 : f32 to vector<8x256xf32>
    %114 = arith.maximumf %112, %113 : vector<8x256xf32>
    %c0_28 = arith.constant 0 : index
    %c0_29 = arith.constant 0 : index
    %c0_30 = arith.constant 0 : index
    %115 = vector.load %arg7[%c0_28, %c0_29, %c0_30] : memref<1x8x256xf32, #tpu.memory_space<vmem>>, vector<1x8x256xf32>
    %116 = vector.shape_cast %115 : vector<1x8x256xf32> to vector<8x256xf32>
    %117 = vector.shape_cast %114 : vector<8x256xf32> to vector<1x8x256xf32>
    tpu.vector_store %arg7[%c0_28, %c0_29, %c0_30], %117 {strides = array<i32>} : memref<1x8x256xf32, #tpu.memory_space<vmem>>, vector<1x8x256xf32>,
    return
  }
  func.func @transform_0(%arg0: i32) -> (i32, i32, i32) {
    %c0_i32 = arith.constant 0 : i32
    %c0_i32_0 = arith.constant 0 : i32
    %c0_i32_1 = arith.constant 0 : i32
    return %arg0, %c0_i32, %c0_i32_0 : i32, i32, i32
  }
  func.func @transform_1(%arg0: i32) -> (i32, i32) {
    %c0_i32 = arith.constant 0 : i32
    %c0_i32_0 = arith.constant 0 : i32
    %c0_i32_1 = arith.constant 0 : i32
    return %c0_i32, %c0_i32_0 : i32, i32
  }
  func.func @transform_2(%arg0: i32) -> (i32, i32) {
    %c0_i32 = arith.constant 0 : i32
    %c0_i32_0 = arith.constant 0 : i32
    %c0_i32_1 = arith.constant 0 : i32
    return %c0_i32, %c0_i32_0 : i32, i32
  }
  func.func @transform_3(%arg0: i32) -> (i32, i32) {
    %c0_i32 = arith.constant 0 : i32
    %c0_i32_0 = arith.constant 0 : i32
    %c0_i32_1 = arith.constant 0 : i32
    return %c0_i32, %c0_i32_0 : i32, i32
  }
  func.func @transform_4(%arg0: i32) -> (i32, i32) {
    %c0_i32 = arith.constant 0 : i32
    %c0_i32_0 = arith.constant 0 : i32
    %c0_i32_1 = arith.constant 0 : i32
    return %c0_i32, %c0_i32_0 : i32, i32
  }
  func.func @transform_5(%arg0: i32) -> (i32, i32) {
    %c0_i32 = arith.constant 0 : i32
    %c0_i32_0 = arith.constant 0 : i32
    %c0_i32_1 = arith.constant 0 : i32
    return %c0_i32, %c0_i32_0 : i32, i32
  }
  func.func @transform_6(%arg0: i32) -> (i32, i32, i32) {
    %c0_i32 = arith.constant 0 : i32
    %c0_i32_0 = arith.constant 0 : i32
    %c0_i32_1 = arith.constant 0 : i32
    return %arg0, %c0_i32, %c0_i32_0 : i32, i32, i32
  }
}

</mosaic_0001>

<bundles_post_ra>
// kernel: tpu_custom_call.1
= control target key start
LH: loop header
LB: loop body
LE: loop exit
PB: predicated region body
PF: predicated region fallthrough
CT: control target
= control target key end

     0   :  { %s2501_s0 = inlined_call_operand.hbm [shape: f32[2,4,256], index: 0, kind: input, shape index: {}]   ;;  %s2502_s1 = inlined_call_operand.hbm [shape: f32[4,256], index: 1, kind: input, shape index: {}]   ;;  %s2503_s2 = inlined_call_operand.hbm [shape: f32[4,6], index: 2, kind: input, shape index: {}]   ;;  %s2504_s3 = inlined_call_operand.hbm [shape: f32[8,5], index: 3, kind: input, shape index: {}]   ;;  %s2505_s4 = inlined_call_operand.hbm [shape: f32[8,6], index: 4, kind: input, shape index: {}]   ;;  %s2506_s5 = inlined_call_operand.vmem [shape: f32[8,9], index: 5, kind: input, shape index: {}]   ;;  %s2507_s6 = inlined_call_operand.hbm [shape: f32[2,8,256], index: 6, kind: output, shape index: {}]  }
   0x1   :  { %2512 = sst [smem:[#allocation16_spill]] %s2502_s1 }
   0x2   :  { %11 = vsyncpa [#allocation3], 0 }
   0x3   :  { %13 = vsyncpa [#allocation3 + $0x1], 0 }
   0x4   :  { %14 = vsyncpa [#allocation6], 0 }
   0x5   :  { %15 = vsyncpa [#allocation9], 0 }
   0x6   :  { %16 = vsyncpa [#allocation4], 0 }
   0x7   :  { %18 = vsyncpa [#allocation4 + $0x1], 0  ;;  %s1864_s21 = smov 0   ;;  %s1866_s22 = smov 0  }
   0x8   :  { %s1868_s23 = smov 0   ;;  %s1870_s24 = smov 0  }
   0x9 LB: > { %s1811_s25 = smov [#allocation5]   ;;  %s1885_s27 = sadd.s32 4294967295, %s1809_s24   ;;  %s1809_s24 = sphi %s1870_s24, %s2534_s24   ;;  %s1805_s23 = sphi %s1868_s23, %s2533_s23   ;;  %s1801_s22 = sphi %s1866_s22, %s2532_s22   ;;  %s1797_s21 = sphi %s1864_s21, %s2531_s21  }
   0xa   : > { %s199_s26 = sshll.u32 %s1811_s25, 4  ;;  %p1464_p0 = scmp.ge.s32.totalorder %s1809_s24, 1  ;;  %s200_s26 = int_to_ptr.vmem [resolvable:$true] %s199_s26 }
   0xb   : > { %p2508_p1 = scmp.eq.s32.totalorder %s1885_s27, 0  ;;  %p186_p2 = scmp.lt.s32.totalorder %s1809_s24, 3 }
   0xc   : > { %s1812_s29 = smov [#allocation8]   ;;  %s1813_s7 = smov [#allocation7]  }
   0xd   : > { %p1890_p3 = pnand %p1464_p0, %p186_p2  ;;  %s221_s30 = sshll.u32 %s1812_s29, 4  ;;  %s222_s30 = int_to_ptr.vmem [resolvable:$true] %s221_s30 }
   0xe   : > { %s210_s8 = sshll.u32 %s1813_s7, 4  ;;  %s1814_s10 = smov [#allocation10]   ;;  %s1903_s8 = int_to_ptr.vmem [resolvable:$true] %s210_s8 }
   0xf   : > { %s2513_s28 = scalar_select %p1890_p3, 1, 0 }
  0x10   : > { %p1511_p5 = pneg %p1890_p3  ;;  %s1905_s11 = sshll.u32 %s1814_s10, 4  ;;  %s233_s11 = int_to_ptr.vmem [resolvable:$true] %s1905_s11 }
  0x11   : > { %s1616_s12 = scalar_lea.vmem %s200_s26, 128  ;;  %p1624_p11 = scmp.lt.s32.totalorder %s200_s26, %s200_s26 }
  0x12   : > { %p1899_p6 = pnand %p1511_p5, %p2508_p1  ;;  %p1617_p8 = scmp.ne.s32.totalorder %s200_s26, %s1616_s12 }
  0x13   : > { %p1625_p12 = scmp.lt.s32.totalorder %s1616_s12, %s1616_s12 }
  0x14   : > { %p1607_p7 = pneg %p1899_p6 }
  0x15   : > { %p1626_p13 = por %p1625_p12, %p1624_p11 }
  0x16   : > { %p1619_p9 = pnand %p1617_p8, %p1607_p7 }
  0x18   : > { %p1620_p10 = pneg %p1619_p9 }
  0x1a   : > { %p1627_p0 = pnand %p1626_p13, %p1620_p10 }
  0x1c   : > { %1630 = shalt.err (!%p1627_p0)
}
  0x1d   : > { %s2515_s1 = sld [smem:[#allocation16_spill]]  ;;  %s1642_s15 = scalar_lea.vmem %s222_s30, 128 }
  0x1e   : > { %p1643_p2 = scmp.ne.s32.totalorder %s222_s30, %s1642_s15  ;;  %p1650_p8 = scmp.lt.s32.totalorder %s222_s30, %s222_s30 }
  0x1f   : > { %p1651_p9 = scmp.lt.s32.totalorder %s1642_s15, %s1642_s15 }
  0x20   : > { %p1645_p5 = pnand %p1643_p2, %p1607_p7 }
  0x21   : > { %p1652_p1 = por %p1651_p9, %p1650_p8 }
  0x22   : > { %p1646_p4 = pneg %p1645_p5 }
  0x23   : > { %1514 = dma.hbm_to_vmem [thread:$0]  (!%p1899_p6), %s2515_s1, 128, %s200_s26, [#allocation6]  }
  0x24   : > { %p1653_p3 = pnand %p1652_p1, %p1646_p4 }
  0x26   : > { %1656 = shalt.err (!%p1653_p3)
}
  0x27   : > { %1520 = dma.hbm_to_vmem [thread:$0]  (!%p1899_p6), %s2504_s3, 128, %s222_s30, [#allocation9]  }
  0x28   : > { %s1668_s18 = scalar_lea.vmem %s1903_s8, 64  ;;  %p1676_p13 = scmp.lt.s32.totalorder %s1903_s8, %s1903_s8 }
  0x29   : > { %p1669_p10 = scmp.ne.s32.totalorder %s1903_s8, %s1668_s18  ;;  %p1677_p1 = scmp.lt.s32.totalorder %s1668_s18, %s1668_s18 }
  0x2b   : > { %p1671_p11 = pnand %p1669_p10, %p1607_p7  ;;  %p1678_p3 = por %p1677_p1, %p1676_p13 }
  0x2d   : > { %p1672_p12 = pneg %p1671_p11 }
  0x2f   : > { %p1679_p4 = pnand %p1678_p3, %p1672_p12 }
  0x31   : > { %1682 = shalt.err (!%p1679_p4)
}
  0x32   : > { %1517 = dma.hbm_to_vmem [thread:$0]  (!%p1899_p6), %s2503_s2, 64, %s1903_s8, [#allocation6]  }
  0x33   : > { %s1694_s25 = scalar_lea.vmem %s233_s11, 128  ;;  %p1702_p8 = scmp.lt.s32.totalorder %s233_s11, %s233_s11 }
  0x34   : > { %p1695_p0 = scmp.ne.s32.totalorder %s233_s11, %s1694_s25  ;;  %p1703_p9 = scmp.lt.s32.totalorder %s1694_s25, %s1694_s25 }
  0x36   : > { %p1697_p2 = pnand %p1695_p0, %p1607_p7  ;;  %p1704_p10 = por %p1703_p9, %p1702_p8 }
  0x38   : > { %p1698_p5 = pneg %p1697_p2 }
  0x3a   : > { %p1705_p11 = pnand %p1704_p10, %p1698_p5 }
  0x3c   : > { %1708 = shalt.err (!%p1705_p11)
}
  0x3d   : > { %1523 = dma.hbm_to_vmem [thread:$0]  (!%p1899_p6), %s2505_s4, 128, %s233_s11, [#allocation9]  }
  0x3e   : > { %s1463_s30 = sadd.s32 4294967294, %s1809_s24   ;;  %s1949_s7 = sadd.s32 1, %s1809_s24  }
  0x3f   : > { %s28_s8 = ssub.s32 %s1809_s24, %s1949_s7  ;;  %s31_s9 = sadd.s32 1, %s1805_s23 }
  0x40   : > { %p29_p7 = scmp.eq.s32.totalorder %s28_s8, 0  ;;  %p38_p12 = scmp.ne.s32.totalorder %s1805_s23, %s1801_s22 }
  0x41   : > { %p39_p13 = scmp.eq.s32.totalorder %s1809_s24, 0  ;;  %p44_p1 = scmp.ne.s32.totalorder %s1801_s22, %s1797_s21 }
  0x42   : > { %s1960_s10 = scalar_select %p29_p7, %s1805_s23, %s31_s9  }
  0x43   : > { %p1962_p3 = por %p39_p13, %p38_p12  ;;  %p2517_p4 = scmp.eq.s32.totalorder %s1885_s27, 0 }
  0x44   : > { %p173_p0 = scmp.eq.s32.totalorder %s1885_s27, 1  ;;  %p179_p2 = scmp.eq.s32.totalorder %s1463_s30, 1 }
  0x45   : > { %p1968_p6 = por %p2517_p4, %p44_p1  ;;  %p1536_p5 = scmp.lt.s32.totalorder %s1809_s24, 2 }
  0x46   : > { %s246_s13 = sand.u32 1, %s1805_s23   ;;  %p1975_p8 = por %p173_p0, %p38_p12 }
  0x47   : > { %s2518_s11 = scalar_select %p1968_p6, 1, 0 }
  0x48   : > { %s2519_s14 = scalar_select %p1975_p8, 1, 0 }
  0x49   : > { %p1979_p9 = por %p179_p2, %p44_p1  ;;  %s1470_s16 = sshll.u32 %s246_s13, 3 }
  0x4a   : > { %s1489_s17 = sshll.u32 %s1809_s24, 7  ;;  %s250_s25 = scalar_lea.vmem [#allocation2], %s1470_s16 }
  0x4b   : > { %s2520_s15 = scalar_select %p1979_p9, 1, 0 }
  0x4c   : > { %s1987_s20 = scalar_lea.hbm %s2501_s0, %s1489_s17  ;;  %s258_s26 = sshll.u32 %s250_s25, 4  ;;  %s259_s26 = int_to_ptr.vmem [resolvable:$true] %s258_s26 }
  0x4d   : > { %p1991_p10 = pnand %p1536_p5, %p1962_p3  ;;  %s247_s30 = scalar_lea.sflag [#allocation3], %s246_s13 }
  0x4e   : > { %s1709_s8 = scalar_lea.hbm %s1987_s20, 128  ;;  %s1714_s18 = scalar_lea.hbm %s2501_s0, 256 }
  0x4f   : > { %p1710_p11 = scmp.ne.s32.totalorder %s1987_s20, %s1709_s8  ;;  %p1711_p7 = pneg %p1991_p10 }
  0x50   : > { %p1715_p1 = scmp.lt.s32.totalorder %s1987_s20, %s2501_s0  ;;  %p1716_p3 = scmp.lt.s32.totalorder %s1714_s18, %s1709_s8 }
  0x51   : > { %p1712_p12 = pnand %p1711_p7, %p1710_p11 }
  0x52   : > { %p1717_p4 = por %p1716_p3, %p1715_p1 }
  0x53   : > { %p1713_p13 = pneg %p1712_p12 }
  0x55   : > { %p1718_p0 = pnand %p1717_p4, %p1713_p13 }
  0x57   : > { %1721 = shalt.err (!%p1718_p0)
}
  0x58   : > { %s1722_s12 = scalar_lea.vmem %s259_s26, 128  ;;  %s1815_s13 = smov [#allocation2]  }
  0x59   : > { %p1723_p2 = scmp.ne.s32.totalorder %s259_s26, %s1722_s12  ;;  %s1727_s25 = sshll.u32 %s1815_s13, 4  ;;  %s1728_s25 = int_to_ptr.vmem [resolvable:$false] %s1727_s25 }
  0x5a   : > { %s1729_s1 = scalar_lea.vmem %s1728_s25, 256  ;;  %p1730_p11 = scmp.lt.s32.totalorder %s259_s26, %s1728_s25 }
  0x5b   : > { %p1725_p5 = pnand %p1723_p2, %p1711_p7  ;;  %p1731_p12 = scmp.lt.s32.totalorder %s1729_s1, %s1722_s12 }
  0x5d   : > { %p1726_p9 = pneg %p1725_p5  ;;  %p1732_p8 = por %p1731_p12, %p1730_p11 }
  0x5f   : > { %p1733_p6 = pnand %p1732_p8, %p1726_p9 }
  0x61   : > { %1736 = shalt.err (!%p1733_p6)
}
  0x62   : > { %1527 = dma.hbm_to_vmem [thread:$0]  (!%p1991_p10), %s1987_s20, 128, %s259_s26, %s247_s30  }
  0x63   : > { %p2522_p13 = scmp.ne.s32.totalorder %s2513_s28, 0 }
  0x64   : > { %s2012_s8 = sand.u32 (!%p2522_p13), 1, %s1801_s22   ;;  %p2523_p7 = scmp.ne.s32.totalorder (!%p2522_p13), %s2518_s11, 0 }
  0x65   : > { %267 = sbr.rel (%p2522_p13) target bundleno = 1108 (0x454), region = 44  ;;  %s1474_s9 = sshll.u32 (!%p2522_p13), %s2012_s8, 3 }
  0x66   : > { %s270_s17 = scalar_lea.sflag (!%p2522_p13), [#allocation3], %s2012_s8  ;;  %s273_s18 = scalar_lea.vmem (!%p2522_p13), [#allocation2], %s1474_s9 }
  0x6a   : > { %1780 = dma.done.wait (%p2523_p7), %s270_s17, 128  }
  0x6b   : > { %1782 = vsyncadd (%p2523_p7), %s270_s17, 4294967168  ;;  %p2524_p6 = scmp.eq.s32.totalorder %s1885_s27, 0 }
  0x6d   : > { %1784 = dma.done.wait (%p2524_p6), [#allocation6], 192   ;;  %p2525_p8 = pmov %p2524_p6 }
  0x6e   : > { %p2526_p9 = pmov %p2524_p6 }
  0x6f   : > { %1786 = vsyncadd (%p2525_p8), [#allocation6], 4294967104 }
  0x70   : > { %1788 = dma.done.wait (%p2526_p9), [#allocation9], 256   ;;  %p2527_p10 = pmov %p2524_p6 }
  0x71   : > { %v1816_v0 = vmov 1   ;;  %v1817_v1 = vmov 0   ;;  %v2030_v2 = vld [vmem:[%s273_s18] sm:$0xff]  ;;  %s1818_s1 = smov 112   ;;  %s1819_s28 = smov 16   ;;  %v1820_v5 = vmov 2   ;;  %v332_v8 = vlaneseq }
  0x72   : > { %1790 = vsyncadd (%p2527_p10), [#allocation9], 4294967040  ;;  %1591 = vset.pattern.permute.xlu1 %v1816_v0  ;;  %1590 = vset.pattern.permute.xlu0 %v1817_v1  ;;  %v2038_v3 = vcombine.high %v2030_v2, %v2030_v2  ;;  %v2044_v4 = vld [vmem:[#allocation7] sm:$0xf]  ;;  %v1821_v6 = vmov 4   ;;  %v1822_v7 = vmov 3  }
  0x73   : > { %353 = vrot.lane.b32.xlu1 %v2030_v2, %s1818_s1  ;;  %328 = vrot.lane.b32.xlu0 %v2030_v2, %s1819_s28  ;;  %v2052_v9 = vand.u32 127, %v332_v8  ;;  %v2054_v12 = vshrl.u32 %v332_v8, 7  ;;  %v2058_v13 = vld [vmem:[#allocation5] sm:$0xff]  ;;  %vm415_vm3 = vcmask 1041409   ;;  %vm417_vm4 = vcmask 1042434   ;;  %s1823_s11 = smov 1  }
  0x74   : > { %vm319_vm2 = vcmp.ne.f32.partialorder %v2058_v13, 0.0  ;;  %vm419_vm5 = vcmask 1043459   ;;  %s1824_s20 = smov 127   ;;  %vm648_vm8 = vcmask 1043456   ;;  %vm645_vm9 = vcmask 31744   ;;  %s1479_s30 = sshll.u32 %s2012_s8, 4 }
  0x75   : > { %vm357_vm0 = vcmp.lt.s32.totalorder %v2052_v9, 112  ;;  %vm334_vm1 = vcmp.lt.s32.totalorder %v2052_v9, 16  ;;  %v2061_v14 = vsub.s32 0, %v2054_v12  ;;  %v2073_v21 = vsub.s32 4, %v2054_v12  ;;  %s1490_s16 = sshll.u32 %s1885_s27, 8  ;;  %s317_s19 = scalar_lea.vmem [#allocation11], %s1479_s30 }
  0x76   : > { %v2076_v24 = vsub.s32 1, %v2054_v12  ;;  %v2079_v25 = vsub.s32 5, %v2054_v12  ;;  %vm492_vm6 = vcmp.lt.s32.totalorder %v2052_v9, 1  ;;  %vm513_vm7 = vcmp.lt.s32.totalorder %v2052_v9, 127  ;;  %s1355_s12 = sshll.u32 %s317_s19, 4  ;;  %s1353_s9 = scalar_lea.hbm %s2507_s6, %s1490_s16  ;;  %s1356_s12 = int_to_ptr.vmem [resolvable:$true] %s1355_s12 }
  0x77   : > { %355 = vrot.lane.b32.xlu1 %v2038_v3, %s1818_s1  ;;  %330 = vrot.lane.b32.xlu0 %v2038_v3, %s1819_s28  ;;  %vm872_vm10 = vcmask 1044484   ;;  %vm874_vm11 = vcmask 1045509   ;;  %vm876_vm12 = vcmask 1046534   ;;  %vm878_vm13 = vcmask 1047559   ;;  %s1341_s17 = scalar_lea.sflag [#allocation4], %s2012_s8  ;;  %s1737_s18 = scalar_lea.vmem %s1356_s12, 256 }
  0x78   : > { %vm1262_vm14 = vcmask 64512   ;;  %p1738_p1 = scmp.ne.s32.totalorder %s1356_s12, %s1737_s18  ;;  %p2528_p3 = scmp.ne.s32.totalorder %s2519_s14, 0 }
  0x7a   : > { %p1739_p4 = pnand %p1738_p1, %p2528_p3 }
  0x7b   : > { %429 = vperm.xlu1 %1591, %v2044_v4   ;;  %376 = vperm.xlu0 %1590, %v2044_v4  }
  0x7c   : > { %p1740_p0 = pneg %p1739_p4 }
  0x7f   : > { %1592 = vset.pattern.permute.xlu1 %v1820_v5  ;;  %1593 = vset.pattern.permute.xlu0 %v1822_v7 }
  0x80   : > { %437 = vperm.xlu1 %1592, %v2044_v4  }
  0x84   : > { %1594 = vset.pattern.permute.xlu1 %v1821_v6 }
  0xe5   : > { %v354_v10 = vpop.permute.xlu1 %353  ;;  %v329_v11 = vpop.permute.xlu0 %328 }
  0xe9   : > { %v356_v15 = vpop.permute.xlu1 %355  ;;  %v331_v16 = vpop.permute.xlu0 %330 }
  0xea   : > { %v358_v17 = vsel %vm357_vm0, %v354_v10, %v356_v15  ;;  %v359_v18 = vsel %vm357_vm0, %v356_v15, %v354_v10  ;;  %v335_v19 = vsel %vm334_vm1, %v329_v11, %v331_v16  ;;  %v336_v20 = vsel %vm334_vm1, %v331_v16, %v329_v11 }
  0xeb   : > { %v362_v22 = vcombine.low %v358_v17, %v359_v18  ;;  %v341_v23 = vcombine.low %v336_v20, %v335_v19 }
  0xed   : > { %v363_v26 = vrot.slane %v362_v22, 7  ;;  %v342_v27 = vrot.slane %v341_v23, 1  ;;  %v364_v28 = vrot.slane %v362_v22, 1  ;;  %v343_v29 = vrot.slane %v341_v23, 2 }
  0xee   : > { %v349_v30 = vsel %vm319_vm2, %v341_v23, 0.0  ;;  %v344_v31 = vrot.slane %v341_v23, 3  ;;  %v371_v39 = vsel %vm319_vm2, %v362_v22, 0.0  ;;  %v365_v42 = vrot.slane %v362_v22, 2 }
  0xef   : > { %v350_v32 = vsel %vm319_vm2, %v342_v27, 0.0  ;;  %v386_v33 = vrot.slane %v349_v30, %v2061_v14  ;;  %v390_v34 = vrot.slane %v349_v30, %v2073_v21  ;;  %v351_v35 = vsel %vm319_vm2, %v343_v29, 0.0 }
  0xf0   : > { %v394_v36 = vrot.slane %v350_v32, %v2061_v14  ;;  %v398_v37 = vrot.slane %v350_v32, %v2073_v21  ;;  %v370_v38 = vsel %vm319_vm2, %v363_v26, 0.0  ;;  %v402_v40 = vrot.slane %v351_v35, %v2061_v14 }
  0xf1   : > { %v406_v41 = vrot.slane %v351_v35, %v2073_v21  ;;  %v352_v43 = vsel %vm319_vm2, %v344_v31, 0.0  ;;  %v372_v46 = vsel %vm319_vm2, %v364_v28, 0.0  ;;  %v447_v47 = vrot.slane %v370_v38, %v2076_v24  ;;  %v2144_v31 = vld [vmem:[#allocation8] sm:$0xff] }
  0xf2   : > { %v416_v44 = vsel %vm415_vm3, %v394_v36, %v386_v33  ;;  %v421_v45 = vsel %vm415_vm3, %v398_v37, %v390_v34  ;;  %v451_v48 = vrot.slane %v370_v38, %v2079_v25  ;;  %v455_v51 = vrot.slane %v371_v39, %v2076_v24 }
  0xf3   : > { %v418_v49 = vsel %vm417_vm4, %v402_v40, %v416_v44  ;;  %v422_v50 = vsel %vm417_vm4, %v406_v41, %v421_v45  ;;  %v459_v52 = vrot.slane %v371_v39, %v2079_v25  ;;  %v410_v53 = vrot.slane %v352_v43, %v2061_v14 }
  0xf4   : > { %v414_v54 = vrot.slane %v352_v43, %v2073_v21  ;;  %v463_v55 = vrot.slane %v372_v46, %v2076_v24  ;;  %v467_v56 = vrot.slane %v372_v46, %v2079_v25  ;;  %v373_v59 = vsel %vm319_vm2, %v365_v42, 0.0 }
  0xf5   : > { %v476_v60 = vsel %vm415_vm3, %v455_v51, %v447_v47  ;;  %v479_v61 = vsel %vm415_vm3, %v459_v52, %v451_v48  ;;  %v420_v8 = vsel %vm419_vm5, %v410_v53, %v418_v49  ;;  %v471_v18 = vrot.slane %v373_v59, %v2076_v24 }
  0xf6   : > { %v430_v57 = vpop.permute.xlu1 %429  ;;  %v377_v58 = vpop.permute.xlu0 %376  ;;  %v423_v10 = vsel %vm419_vm5, %v414_v54, %v422_v50  ;;  %v477_v16 = vsel %vm417_vm4, %v463_v55, %v476_v60  ;;  %v480_v17 = vsel %vm417_vm4, %v467_v56, %v479_v61  ;;  %v475_v19 = vrot.slane %v373_v59, %v2079_v25 }
  0xf7   : > { %v432_v62 = vmul.f32 %v430_v57, %v2030_v2  ;;  %v433_v63 = vmul.f32 %v430_v57, %v2038_v3  ;;  %v426_v11 = vmul.f32 %v420_v8, %v377_v58  ;;  %v427_v15 = vmul.f32 %v423_v10, %v377_v58 }
  0xf8   : > { %v478_v22 = vsel %vm419_vm5, %v471_v18, %v477_v16  ;;  %v481_v2 = vsel %vm419_vm5, %v475_v19, %v480_v17  ;;  %v1825_v30 = vmov 5   ;;  %v1826_v32 = vmov 0.0  }
  0xf9   : > { %v434_v3 = vadd.f32 %v432_v62, %v426_v11  ;;  %v435_v23 = vadd.f32 %v433_v63, %v427_v15  ;;  %719 = vmatprep.mubr.f32.mxu0 %v1826_v32  ;;  %1329 = vmatprep.mubr.f32.mxu1 %v1826_v32  ;;  %v2174_v53 = vsub.s32 3, %v2054_v12  ;;  %v2177_v55 = vsub.s32 7, %v2054_v12 }
  0xfb   : > { %v438_v20 = vpop.permute.xlu1 %437 }
  0xfc   : > { %v484_v26 = vmul.f32 %v478_v22, %v438_v20  ;;  %v485_v27 = vmul.f32 %v481_v2, %v438_v20 }
  0xfe   : > { %v2127_v28 = vadd.f32 %v484_v26, %v434_v3  ;;  %v2129_v29 = vadd.f32 %v485_v27, %v435_v23 }
 0x100   : > { %490 = vrot.lane.b32.xlu1 %v2129_v29, %s1823_s11  ;;  %488 = vrot.lane.b32.xlu0 %v2127_v28, %s1823_s11 }
 0x104   : > { %511 = vrot.lane.b32.xlu1 %v2129_v29, %s1824_s20  ;;  %509 = vrot.lane.b32.xlu0 %v2127_v28, %s1824_s20 }
 0x108   : > { %581 = vperm.xlu1 %1594, %v2044_v4   ;;  %531 = vperm.xlu0 %1593, %v2044_v4  }
 0x10c   : > { %1595 = vset.pattern.permute.xlu1 %v1825_v30  ;;  %1596 = vset.pattern.permute.xlu0 %v1821_v6 }
 0x10d   : > { %589 = vperm.xlu1 %1595, %v2044_v4   ;;  %642 = vperm.xlu0 %1596, %v2144_v31  }
 0x111   : > { %1598 = vset.pattern.permute.xlu1 %v1816_v0  ;;  %1597 = vset.pattern.permute.xlu0 %v1817_v1  ;;  %v2156_v0 = vsub.s32 2, %v2054_v12  ;;  %v2159_v1 = vsub.s32 6, %v2054_v12 }
 0x172   : > { %v491_v33 = vpop.permute.xlu1 %490  ;;  %v489_v34 = vpop.permute.xlu0 %488 }
 0x173   : > { %v493_v35 = vsel %vm492_vm6, %v489_v34, %v491_v33  ;;  %v494_v4 = vsel %vm492_vm6, %v491_v33, %v489_v34 }
 0x174   : > { %v497_v36 = vcombine.low %v494_v4, %v493_v35 }
 0x176   : > { %v498_v37 = vrot.slane %v497_v36, 6  ;;  %v499_v38 = vrot.slane %v497_v36, 7  ;;  %v512_v39 = vpop.permute.xlu1 %511  ;;  %v510_v40 = vpop.permute.xlu0 %509  ;;  %v500_v54 = vrot.slane %v497_v36, 1  ;;  %v507_v56 = vsel %vm319_vm2, %v497_v36, 0.0 }
 0x177   : > { %v514_v41 = vsel %vm513_vm7, %v510_v40, %v512_v39  ;;  %v515_v42 = vsel %vm513_vm7, %v512_v39, %v510_v40  ;;  %v557_v11 = vrot.slane %v507_v56, %v2156_v0  ;;  %v561_v15 = vrot.slane %v507_v56, %v2159_v1  ;;  %v2224_v56 = vld [vmem:[#allocation10] sm:$0xff] }
 0x178   : > { %v518_v43 = vcombine.low %v514_v41, %v515_v42  ;;  %v505_v44 = vsel %vm319_vm2, %v498_v37, 0.0  ;;  %v506_v45 = vsel %vm319_vm2, %v499_v38, 0.0  ;;  %v508_v10 = vsel %vm319_vm2, %v500_v54, 0.0 }
 0x179   : > { %v541_v46 = vrot.slane %v505_v44, %v2156_v0  ;;  %v545_v47 = vrot.slane %v505_v44, %v2159_v1  ;;  %v549_v48 = vrot.slane %v506_v45, %v2156_v0  ;;  %v553_v52 = vrot.slane %v506_v45, %v2159_v1 }
 0x17a   : > { %v519_v49 = vrot.slane %v518_v43, 5  ;;  %v520_v50 = vrot.slane %v518_v43, 6  ;;  %v521_v51 = vrot.slane %v518_v43, 7  ;;  %v565_v2 = vrot.slane %v508_v10, %v2156_v0 }
 0x17b   : > { %v570_v59 = vsel %vm415_vm3, %v549_v48, %v541_v46  ;;  %v573_v62 = vsel %vm415_vm3, %v553_v52, %v545_v47  ;;  %v569_v3 = vrot.slane %v508_v10, %v2159_v1  ;;  %v529_v27 = vsel %vm319_vm2, %v518_v43, 0.0 }
 0x17c   : > { %v526_v57 = vsel %vm319_vm2, %v519_v49, 0.0  ;;  %v527_v58 = vsel %vm319_vm2, %v520_v50, 0.0  ;;  %v528_v60 = vsel %vm319_vm2, %v521_v51, 0.0  ;;  %v571_v18 = vsel %vm417_vm4, %v557_v11, %v570_v59 }
 0x17d   : > { %v599_v61 = vrot.slane %v526_v57, %v2174_v53  ;;  %v603_v12 = vrot.slane %v526_v57, %v2177_v55  ;;  %v607_v63 = vrot.slane %v527_v58, %v2174_v53  ;;  %v611_v8 = vrot.slane %v527_v58, %v2177_v55 }
 0x17e   : > { %v615_v16 = vrot.slane %v528_v60, %v2174_v53  ;;  %v619_v17 = vrot.slane %v528_v60, %v2177_v55  ;;  %v574_v19 = vsel %vm417_vm4, %v561_v15, %v573_v62  ;;  %v572_v32 = vsel %vm419_vm5, %v565_v2, %v571_v18 }
 0x17f   : > { %v628_v20 = vsel %vm415_vm3, %v607_v63, %v599_v61  ;;  %v631_v22 = vsel %vm415_vm3, %v611_v8, %v603_v12  ;;  %v575_v33 = vsel %vm419_vm5, %v569_v3, %v574_v19  ;;  %v623_v39 = vrot.slane %v529_v27, %v2174_v53 }
 0x180   : > { %v629_v34 = vsel %vm417_vm4, %v615_v16, %v628_v20  ;;  %v632_v35 = vsel %vm417_vm4, %v619_v17, %v631_v22  ;;  %v627_v40 = vrot.slane %v529_v27, %v2177_v55 }
 0x181   : > { %v630_v42 = vsel %vm419_vm5, %v623_v39, %v629_v34 }
 0x182   : > { %v633_v43 = vsel %vm419_vm5, %v627_v40, %v632_v35 }
 0x183   : > { %v582_v23 = vpop.permute.xlu1 %581  ;;  %v532_v26 = vpop.permute.xlu0 %531 }
 0x184   : > { %v584_v4 = vmul.f32 %v582_v23, %v2127_v28  ;;  %v585_v36 = vmul.f32 %v582_v23, %v2129_v29  ;;  %v578_v37 = vmul.f32 %v572_v32, %v532_v26  ;;  %v579_v38 = vmul.f32 %v575_v33, %v532_v26 }
 0x186   : > { %v586_v44 = vadd.f32 %v584_v4, %v578_v37  ;;  %v587_v47 = vadd.f32 %v585_v36, %v579_v38 }
 0x188   : > { %v590_v41 = vpop.permute.xlu1 %589  ;;  %v643_v29 = vpop.permute.xlu0 %642 }
 0x189   : > { %v636_v45 = vmul.f32 %v630_v42, %v590_v41  ;;  %v637_v46 = vmul.f32 %v633_v43, %v590_v41 }
 0x18b   : > { %v638_v48 = vadd.f32 %v636_v45, %v586_v44  ;;  %v639_v28 = vadd.f32 %v637_v46, %v587_v47 }
 0x18d   : > { %1480 = vmatprep.subr.msk.mxu0 %vm648_vm8, %v639_v28 }
 0x18e   : > { %1481 = vmatpush1.msk.msra.mxu0 %vm648_vm8, %v638_v48 }
 0x18f   : > { %1482 = vmatmul.mubr.msk.f32.vlgmr.msra.gmra.mxu0 %vm645_vm9, %v2144_v31 }
 0x24f   : > { %v721_v49 = vpop.f32.mrf.mxu0 }
 0x250   : > { %v722_v50 = vadd.f32 %v721_v49, %v643_v29 }
 0x251   : > { %v723_v51 = vpop.f32.mrf.mxu0 }
 0x252   : > { %v2218_v52 = vmax.f32 %v722_v50, 0.0  ;;  %v724_v54 = vadd.f32 %v723_v51, %v643_v29 }
 0x254   : > { %760 = vrot.lane.b32.xlu0 %v2218_v52, %s1818_s1  ;;  %728 = vrot.lane.b32.xlu1 %v2218_v52, %s1819_s28  ;;  %v2226_v57 = vmax.f32 %v724_v54, 0.0 }
 0x258   : > { %730 = vrot.lane.b32.xlu1 %v2226_v57, %s1819_s28  ;;  %794 = vperm.xlu0 %1597, %v2224_v56  }
 0x25c   : > { %762 = vrot.lane.b32.xlu1 %v2226_v57, %s1818_s1  ;;  %1600 = vset.pattern.permute.xlu0 %v1822_v7  ;;  %s1828_s1 = smov [#allocation11]  }
 0x25d   : > { %s1741_s27 = sshll.u32 %s1828_s1, 4  ;;  %s1742_s27 = int_to_ptr.vmem [resolvable:$false] %s1741_s27 }
 0x25e   : > { %s1743_s28 = scalar_lea.vmem %s1742_s27, 512  ;;  %p1744_p2 = scmp.lt.s32.totalorder %s1356_s12, %s1742_s27 }
 0x25f   : > { %p1745_p5 = scmp.lt.s32.totalorder %s1743_s28, %s1737_s18 }
 0x260   : > { %892 = vperm.xlu1 %1598, %v2224_v56  }
 0x261   : > { %p1746_p11 = por %p1745_p5, %p1744_p2 }
 0x263   : > { %p1747_p12 = pnand %p1746_p11, %p1740_p0 }
 0x264   : > { %1599 = vset.pattern.permute.xlu1 %v1820_v5 }
 0x265   : > { %900 = vperm.xlu1 %1599, %v2224_v56  }
 0x269   : > { %1601 = vset.pattern.permute.xlu1 %v1821_v6 }
 0x2c6   : > { %v729_v31 = vpop.permute.xlu1 %728  ;;  %v761_v10 = vpop.permute.xlu0 %760 }
 0x2ca   : > { %v731_v58 = vpop.permute.xlu1 %730 }
 0x2cb   : > { %v732_v59 = vsel %vm334_vm1, %v729_v31, %v731_v58  ;;  %v733_v60 = vsel %vm334_vm1, %v731_v58, %v729_v31 }
 0x2cc   : > { %v736_v61 = vcombine.low %v733_v60, %v732_v59  ;;  %v737_v62 = vcombine.high %v733_v60, %v732_v59 }
 0x2ce   : > { %v738_v12 = vrot.slane %v736_v61, 1  ;;  %v739_v7 = vrot.slane %v736_v61, 2  ;;  %v740_v63 = vrot.slane %v736_v61, 3  ;;  %v763_v8 = vpop.permute.xlu1 %762  ;;  %v752_v5 = vsel %vm319_vm2, %v736_v61, 0.0 }
 0x2cf   : > { %v741_v11 = vrot.slane %v737_v62, 1  ;;  %v742_v15 = vrot.slane %v737_v62, 2  ;;  %v764_v17 = vsel %vm357_vm0, %v761_v10, %v763_v8  ;;  %v756_v19 = vsel %vm319_vm2, %v737_v62, 0.0 }
 0x2d0   : > { %v753_v6 = vsel %vm319_vm2, %v738_v12, 0.0  ;;  %v754_v16 = vsel %vm319_vm2, %v739_v7, 0.0  ;;  %v755_v18 = vsel %vm319_vm2, %v740_v63, 0.0  ;;  %v808_v20 = vrot.slane %v752_v5, %v2061_v14 }
 0x2d1   : > { %v812_v22 = vrot.slane %v752_v5, %v2073_v21  ;;  %v816_v2 = vrot.slane %v753_v6, %v2061_v14  ;;  %v765_v3 = vsel %vm357_vm0, %v763_v8, %v761_v10  ;;  %v743_v23 = vrot.slane %v737_v62, 3 }
 0x2d2   : > { %v820_v26 = vrot.slane %v753_v6, %v2073_v21  ;;  %v824_v27 = vrot.slane %v754_v16, %v2061_v14  ;;  %v768_v32 = vcombine.low %v764_v17, %v765_v3  ;;  %v769_v33 = vcombine.high %v764_v17, %v765_v3 }
 0x2d3   : > { %v828_v34 = vrot.slane %v754_v16, %v2073_v21  ;;  %v832_v35 = vrot.slane %v755_v18, %v2061_v14  ;;  %v757_v4 = vsel %vm319_vm2, %v741_v11, 0.0  ;;  %v758_v36 = vsel %vm319_vm2, %v742_v15, 0.0 }
 0x2d4   : > { %v770_v37 = vrot.slane %v768_v32, 7  ;;  %v771_v38 = vrot.slane %v768_v32, 1  ;;  %v772_v39 = vrot.slane %v768_v32, 2  ;;  %v773_v40 = vrot.slane %v769_v33, 7 }
 0x2d5   : > { %v836_v41 = vrot.slane %v755_v18, %v2073_v21  ;;  %v840_v42 = vrot.slane %v756_v19, %v2061_v14  ;;  %v844_v43 = vrot.slane %v756_v19, %v2073_v21  ;;  %v759_v44 = vsel %vm319_vm2, %v743_v23, 0.0 }
 0x2d6   : > { %v784_v45 = vsel %vm319_vm2, %v770_v37, 0.0  ;;  %v785_v46 = vsel %vm319_vm2, %v768_v32, 0.0  ;;  %v848_v47 = vrot.slane %v757_v4, %v2061_v14  ;;  %v852_v48 = vrot.slane %v757_v4, %v2073_v21 }
 0x2d7   : > { %v774_v28 = vrot.slane %v769_v33, 1  ;;  %v786_v29 = vsel %vm319_vm2, %v771_v38, 0.0  ;;  %v856_v49 = vrot.slane %v758_v36, %v2061_v14  ;;  %v860_v50 = vrot.slane %v758_v36, %v2073_v21  ;;  %v795_v38 = vpop.permute.xlu0 %794 }
 0x2d8   : > { %v787_v51 = vsel %vm319_vm2, %v772_v39, 0.0  ;;  %v788_v54 = vsel %vm319_vm2, %v773_v40, 0.0  ;;  %v789_v31 = vsel %vm319_vm2, %v769_v33, 0.0  ;;  %v864_v58 = vrot.slane %v759_v44, %v2061_v14 }
 0x2d9   : > { %v914_v59 = vrot.slane %v784_v45, %v2076_v24  ;;  %v918_v60 = vrot.slane %v784_v45, %v2079_v25  ;;  %v922_v61 = vrot.slane %v785_v46, %v2076_v24  ;;  %v869_v62 = vsel %vm415_vm3, %v816_v2, %v808_v20 }
 0x2da   : > { %v926_v12 = vrot.slane %v785_v46, %v2079_v25  ;;  %v930_v7 = vrot.slane %v786_v29, %v2076_v24  ;;  %v870_v63 = vsel %vm417_vm4, %v824_v27, %v869_v62  ;;  %v880_v8 = vsel %vm415_vm3, %v820_v26, %v812_v22 }
 0x2db   : > { %v934_v5 = vrot.slane %v786_v29, %v2079_v25  ;;  %v938_v14 = vrot.slane %v787_v51, %v2076_v24  ;;  %v871_v10 = vsel %vm419_vm5, %v832_v35, %v870_v63  ;;  %v881_v6 = vsel %vm417_vm4, %v828_v34, %v880_v8  ;;  %v893_v11 = vpop.permute.xlu1 %892 }
 0x2dc   : > { %v942_v15 = vrot.slane %v787_v51, %v2079_v25  ;;  %v873_v16 = vsel %vm872_vm10, %v840_v42, %v871_v10  ;;  %v882_v17 = vsel %vm419_vm5, %v836_v41, %v881_v6  ;;  %v775_v18 = vrot.slane %v769_v33, 2 }
 0x2dd   : > { %v946_v19 = vrot.slane %v788_v54, %v2076_v24  ;;  %v950_v20 = vrot.slane %v788_v54, %v2079_v25  ;;  %v875_v22 = vsel %vm874_vm11, %v848_v47, %v873_v16  ;;  %v883_v2 = vsel %vm872_vm10, %v844_v43, %v882_v17 }
 0x2de   : > { %v868_v3 = vrot.slane %v759_v44, %v2073_v21  ;;  %v877_v23 = vsel %vm876_vm12, %v856_v49, %v875_v22  ;;  %v884_v26 = vsel %vm874_vm11, %v852_v48, %v883_v2  ;;  %v895_v27 = vmul.f32 %v893_v11, %v2218_v52 }
 0x2df   : > { %v885_v32 = vsel %vm876_vm12, %v860_v50, %v884_v26  ;;  %v896_v33 = vmul.f32 %v893_v11, %v2226_v57  ;;  %v790_v34 = vsel %vm319_vm2, %v774_v28, 0.0  ;;  %v975_v35 = vsel %vm415_vm3, %v922_v61, %v914_v59 }
 0x2e0   : > { %v791_v4 = vsel %vm319_vm2, %v775_v18, 0.0  ;;  %v954_v21 = vrot.slane %v789_v31, %v2076_v24  ;;  %v976_v36 = vsel %vm417_vm4, %v930_v7, %v975_v35  ;;  %v982_v37 = vsel %vm415_vm3, %v926_v12, %v918_v60  ;;  %v901_v28 = vpop.permute.xlu1 %900 }
 0x2e1   : > { %v879_v52 = vsel %vm878_vm13, %v864_v58, %v877_v23  ;;  %v958_v39 = vrot.slane %v789_v31, %v2079_v25  ;;  %v977_v57 = vsel %vm419_vm5, %v938_v14, %v976_v36  ;;  %v983_v40 = vsel %vm417_vm4, %v934_v5, %v982_v37 }
 0x2e2   : > { %v886_v41 = vsel %vm878_vm13, %v868_v3, %v885_v32  ;;  %v962_v42 = vrot.slane %v790_v34, %v2076_v24  ;;  %v978_v43 = vsel %vm872_vm10, %v946_v19, %v977_v57  ;;  %v984_v44 = vsel %vm419_vm5, %v942_v15, %v983_v40 }
 0x2e3   : > { %v966_v45 = vrot.slane %v790_v34, %v2079_v25  ;;  %v970_v46 = vrot.slane %v791_v4, %v2076_v24  ;;  %v979_v47 = vsel %vm874_vm11, %v954_v21, %v978_v43  ;;  %v985_v48 = vsel %vm872_vm10, %v950_v20, %v984_v44 }
 0x2e4   : > { %v889_v29 = vmul.f32 %v879_v52, %v795_v38  ;;  %v974_v49 = vrot.slane %v791_v4, %v2079_v25  ;;  %v980_v50 = vsel %vm876_vm12, %v962_v42, %v979_v47  ;;  %v986_v51 = vsel %vm874_vm11, %v958_v39, %v985_v48  ;;  %v2359_v25 = vld [vmem:[%s2506_s5] sm:$0xff] }
 0x2e5   : > { %v890_v54 = vmul.f32 %v886_v41, %v795_v38  ;;  %v981_v31 = vsel %vm878_vm13, %v970_v46, %v980_v50  ;;  %v987_v58 = vsel %vm876_vm12, %v966_v45, %v986_v51  ;;  %v1827_v63 = vmov 8  }
 0x2e6   : > { %v897_v59 = vadd.f32 %v895_v27, %v889_v29  ;;  %v988_v24 = vsel %vm878_vm13, %v974_v49, %v987_v58  ;;  %v991_v60 = vmul.f32 %v981_v31, %v901_v28 }
 0x2e7   : > { %v898_v61 = vadd.f32 %v896_v33, %v890_v54  ;;  %v992_v62 = vmul.f32 %v988_v24, %v901_v28 }
 0x2e8   : > { %v2340_v12 = vadd.f32 %v991_v60, %v897_v59 }
 0x2e9   : > { %v2342_v7 = vadd.f32 %v992_v62, %v898_v61 }
 0x2ea   : > { %995 = vrot.lane.b32.xlu0 %v2340_v12, %s1823_s11 }
 0x2eb   : > { %997 = vrot.lane.b32.xlu1 %v2342_v7, %s1823_s11 }
 0x2ee   : > { %1027 = vrot.lane.b32.xlu0 %v2340_v12, %s1824_s20 }
 0x2ef   : > { %1029 = vrot.lane.b32.xlu1 %v2342_v7, %s1824_s20 }
 0x2f2   : > { %1060 = vperm.xlu0 %1600, %v2224_v56  }
 0x2f3   : > { %1154 = vperm.xlu1 %1601, %v2224_v56  }
 0x2f6   : > { %1603 = vset.pattern.permute.xlu0 %v1827_v63 }
 0x2f7   : > { %1602 = vset.pattern.permute.xlu1 %v1825_v30  ;;  %1259 = vperm.xlu0 %1603, %v2359_v25  }
 0x2f8   : > { %1162 = vperm.xlu1 %1602, %v2224_v56  }
 0x35c   : > { %v996_v8 = vpop.permute.xlu0 %995 }
 0x35d   : > { %v998_v5 = vpop.permute.xlu1 %997 }
 0x35e   : > { %v999_v14 = vsel %vm492_vm6, %v996_v8, %v998_v5  ;;  %v1000_v10 = vsel %vm492_vm6, %v998_v5, %v996_v8 }
 0x35f   : > { %v1003_v30 = vcombine.low %v1000_v10, %v999_v14  ;;  %v1004_v6 = vcombine.high %v1000_v10, %v999_v14 }
 0x360   : > { %v1028_v56 = vpop.permute.xlu0 %1027 }
 0x361   : > { %v1005_v11 = vrot.slane %v1003_v30, 6  ;;  %v1006_v15 = vrot.slane %v1003_v30, 7  ;;  %v1007_v16 = vrot.slane %v1003_v30, 1  ;;  %v1008_v17 = vrot.slane %v1004_v6, 6  ;;  %v1030_v18 = vpop.permute.xlu1 %1029 }
 0x362   : > { %v1031_v20 = vsel %vm513_vm7, %v1028_v56, %v1030_v18  ;;  %v1032_v22 = vsel %vm513_vm7, %v1030_v18, %v1028_v56  ;;  %v1021_v3 = vsel %vm319_vm2, %v1003_v30, 0.0  ;;  %v1009_v23 = vrot.slane %v1004_v6, 7 }
 0x363   : > { %v1019_v19 = vsel %vm319_vm2, %v1005_v11, 0.0  ;;  %v1020_v2 = vsel %vm319_vm2, %v1006_v15, 0.0  ;;  %v1022_v26 = vsel %vm319_vm2, %v1007_v16, 0.0  ;;  %v1023_v27 = vsel %vm319_vm2, %v1008_v17, 0.0 }
 0x364   : > { %v1074_v32 = vrot.slane %v1019_v19, %v2156_v0  ;;  %v1078_v33 = vrot.slane %v1019_v19, %v2159_v1  ;;  %v1035_v34 = vcombine.low %v1031_v20, %v1032_v22  ;;  %v1036_v9 = vcombine.high %v1031_v20, %v1032_v22 }
 0x365   : > { %v1082_v35 = vrot.slane %v1020_v2, %v2156_v0  ;;  %v1086_v4 = vrot.slane %v1020_v2, %v2159_v1  ;;  %v1090_v21 = vrot.slane %v1021_v3, %v2156_v0  ;;  %v1010_v36 = vrot.slane %v1004_v6, 1 }
 0x366   : > { %v1037_v37 = vrot.slane %v1035_v34, 5  ;;  %v1038_v38 = vrot.slane %v1035_v34, 6  ;;  %v1039_v52 = vrot.slane %v1035_v34, 7  ;;  %v1040_v39 = vrot.slane %v1036_v9, 5 }
 0x367   : > { %v1094_v57 = vrot.slane %v1021_v3, %v2159_v1  ;;  %v1098_v40 = vrot.slane %v1022_v26, %v2156_v0  ;;  %v1102_v41 = vrot.slane %v1022_v26, %v2159_v1  ;;  %v1106_v42 = vrot.slane %v1023_v27, %v2156_v0 }
 0x368   : > { %v1110_v43 = vrot.slane %v1023_v27, %v2159_v1  ;;  %v1051_v44 = vsel %vm319_vm2, %v1037_v37, 0.0  ;;  %v1052_v45 = vsel %vm319_vm2, %v1038_v38, 0.0  ;;  %v1024_v46 = vsel %vm319_vm2, %v1009_v23, 0.0 }
 0x369   : > { %v1041_v47 = vrot.slane %v1036_v9, 6  ;;  %v1053_v48 = vsel %vm319_vm2, %v1039_v52, 0.0  ;;  %v1025_v28 = vsel %vm319_vm2, %v1004_v6, 0.0  ;;  %v1135_v29 = vsel %vm415_vm3, %v1082_v35, %v1074_v32 }
 0x36a   : > { %v1042_v49 = vrot.slane %v1036_v9, 7  ;;  %v1054_v50 = vsel %vm319_vm2, %v1035_v34, 0.0  ;;  %v1055_v51 = vsel %vm319_vm2, %v1040_v39, 0.0  ;;  %v1026_v54 = vsel %vm319_vm2, %v1010_v36, 0.0 }
 0x36b   : > { %v1176_v31 = vrot.slane %v1051_v44, %v2174_v53  ;;  %v1180_v58 = vrot.slane %v1051_v44, %v2177_v55  ;;  %v1184_v59 = vrot.slane %v1052_v45, %v2174_v53  ;;  %v1188_v24 = vrot.slane %v1052_v45, %v2177_v55 }
 0x36c   : > { %v1192_v60 = vrot.slane %v1053_v48, %v2174_v53  ;;  %v1196_v61 = vrot.slane %v1053_v48, %v2177_v55  ;;  %v1136_v62 = vsel %vm417_vm4, %v1090_v21, %v1135_v29  ;;  %v1142_v63 = vsel %vm415_vm3, %v1086_v4, %v1078_v33 }
 0x36d   : > { %v1200_v8 = vrot.slane %v1054_v50, %v2174_v53  ;;  %v1114_v5 = vrot.slane %v1024_v46, %v2156_v0  ;;  %v1137_v14 = vsel %vm419_vm5, %v1098_v40, %v1136_v62  ;;  %v1143_v10 = vsel %vm417_vm4, %v1094_v57, %v1142_v63  ;;  %v1061_v34 = vpop.permute.xlu0 %1060 }
 0x36e   : > { %v1155_v30 = vpop.permute.xlu1 %1154  ;;  %v1118_v6 = vrot.slane %v1024_v46, %v2159_v1  ;;  %v1122_v56 = vrot.slane %v1025_v28, %v2156_v0  ;;  %v1138_v11 = vsel %vm872_vm10, %v1106_v42, %v1137_v14  ;;  %v1144_v15 = vsel %vm419_vm5, %v1102_v41, %v1143_v10 }
 0x36f   : > { %v1204_v16 = vrot.slane %v1054_v50, %v2177_v55  ;;  %v1126_v17 = vrot.slane %v1025_v28, %v2159_v1  ;;  %v1139_v18 = vsel %vm874_vm11, %v1114_v5, %v1138_v11  ;;  %v1145_v19 = vsel %vm872_vm10, %v1110_v43, %v1144_v15 }
 0x370   : > { %v1130_v20 = vrot.slane %v1026_v54, %v2156_v0  ;;  %v1140_v22 = vsel %vm876_vm12, %v1122_v56, %v1139_v18  ;;  %v1146_v2 = vsel %vm874_vm11, %v1118_v6, %v1145_v19  ;;  %v1056_v3 = vsel %vm319_vm2, %v1041_v47, 0.0 }
 0x371   : > { %v1157_v23 = vmul.f32 %v1155_v30, %v2340_v12  ;;  %v1158_v26 = vmul.f32 %v1155_v30, %v2342_v7  ;;  %v1134_v27 = vrot.slane %v1026_v54, %v2159_v1  ;;  %v1057_v32 = vsel %vm319_vm2, %v1042_v49, 0.0 }
 0x372   : > { %v1147_v33 = vsel %vm876_vm12, %v1126_v17, %v1146_v2  ;;  %v1058_v0 = vsel %vm319_vm2, %v1036_v9, 0.0  ;;  %v1208_v35 = vrot.slane %v1055_v51, %v2174_v53  ;;  %v1212_v4 = vrot.slane %v1055_v51, %v2177_v55 }
 0x373   : > { %v1141_v21 = vsel %vm878_vm13, %v1130_v20, %v1140_v22  ;;  %v1216_v12 = vrot.slane %v1056_v3, %v2174_v53  ;;  %v1237_v7 = vsel %vm415_vm3, %v1184_v59, %v1176_v31  ;;  %v1244_v1 = vsel %vm415_vm3, %v1188_v24, %v1180_v58  ;;  %v1163_v44 = vpop.permute.xlu1 %1162  ;;  %v1260_v59 = vpop.permute.xlu0 %1259 }
 0x374   : > { %v1220_v36 = vrot.slane %v1056_v3, %v2177_v55  ;;  %v1224_v37 = vrot.slane %v1057_v32, %v2174_v53  ;;  %v1238_v38 = vsel %vm417_vm4, %v1192_v60, %v1237_v7  ;;  %v1245_v13 = vsel %vm417_vm4, %v1196_v61, %v1244_v1 }
 0x375   : > { %v1148_v9 = vsel %vm878_vm13, %v1134_v27, %v1147_v33  ;;  %v1151_v52 = vmul.f32 %v1141_v21, %v1061_v34  ;;  %v1239_v39 = vsel %vm419_vm5, %v1200_v8, %v1238_v38  ;;  %v1246_v57 = vsel %vm419_vm5, %v1204_v16, %v1245_v13 }
 0x376   : > { %v1152_v40 = vmul.f32 %v1148_v9, %v1061_v34  ;;  %v1228_v41 = vrot.slane %v1057_v32, %v2177_v55  ;;  %v1240_v42 = vsel %vm872_vm10, %v1208_v35, %v1239_v39  ;;  %v1247_v43 = vsel %vm872_vm10, %v1212_v4, %v1246_v57 }
 0x377   : > { %v1232_v45 = vrot.slane %v1058_v0, %v2174_v53  ;;  %v1236_v46 = vrot.slane %v1058_v0, %v2177_v55  ;;  %v1241_v47 = vsel %vm874_vm11, %v1216_v12, %v1240_v42  ;;  %v1248_v48 = vsel %vm874_vm11, %v1220_v36, %v1247_v43 }
 0x378   : > { %v1242_v28 = vsel %vm876_vm12, %v1224_v37, %v1241_v47  ;;  %v1249_v29 = vsel %vm876_vm12, %v1228_v41, %v1248_v48  ;;  %v1160_v31 = vadd.f32 %v1158_v26, %v1152_v40  ;;  %v1159_v53 = vadd.f32 %v1157_v23, %v1151_v52 }
 0x379   : > { %v1243_v49 = vsel %vm878_vm13, %v1232_v45, %v1242_v28  ;;  %v1250_v50 = vsel %vm878_vm13, %v1236_v46, %v1249_v29 }
 0x37a   : > { %v1253_v51 = vmul.f32 %v1243_v49, %v1163_v44  ;;  %v1254_v54 = vmul.f32 %v1250_v50, %v1163_v44 }
 0x37c   : > { %v1256_v58 = vadd.f32 %v1254_v54, %v1160_v31  ;;  %v1255_v55 = vadd.f32 %v1253_v51, %v1159_v53 }
 0x37e   : > { %1295 = vmatprep.subr.mxu1 %v1256_v58 }
 0x37f   : > { %1296 = vmatpush1.msra.mxu1 %v1255_v55 }
 0x380   : > { %1483 = vmatmul.mubr.msk.f32.vlgmr.msra.gmra.mxu1 %vm1262_vm14, %v2359_v25 }
 0x440   : > { %v1331_v24 = vpop.f32.mrf.mxu1 }
 0x441   : > { %v1332_v60 = vadd.f32 %v1331_v24, %v1260_v59 }
 0x442   : > { %v1333_v61 = vpop.f32.mrf.mxu1 }
 0x443   : > { %v1336_v62 = vmax.f32 %v1332_v60, 0.0  ;;  %v1334_v63 = vadd.f32 %v1333_v61, %v1260_v59 }
 0x445   : > { %1338 = vst [vmem:[%s317_s19] sm:$0xff] %v1336_v62  ;;  %v1337_v8 = vmax.f32 %v1334_v63, 0.0 }
 0x447   : > { %1339 = vst [vmem:[%s317_s19 + $0x8] sm:$0xff] %v1337_v8 }
 0x448   : > { %1750 = shalt.err (!%p1747_p12)
}
 0x449   : > { %s1751_s11 = scalar_lea.hbm %s1353_s9, 256  ;;  %s1755_s26 = scalar_lea.hbm %s2507_s6, 512 }
 0x44a   : > { %p1752_p13 = scmp.ne.s32.totalorder %s1353_s9, %s1751_s11  ;;  %p1756_p8 = scmp.lt.s32.totalorder %s1353_s9, %s2507_s6 }
 0x44b   : > { %p1757_p9 = scmp.lt.s32.totalorder %s1755_s26, %s1751_s11 }
 0x44c   : > { %p1753_p7 = pnand %p1752_p13, %p2528_p3 }
 0x44d   : > { %p1758_p10 = por %p1757_p9, %p1756_p8 }
 0x44e   : > { %p1754_p6 = pneg %p1753_p7 }
 0x450   : > { %p1759_p1 = pnand %p1758_p10, %p1754_p6 }
 0x452   : > { %1762 = shalt.err (!%p1759_p1)
}
 0x453   : > { %1509 = dma.vmem_to_hbm [thread:$0]  (%p2528_p3), %s1356_s12, 256, %s1353_s9, %s1341_s17  }
 0x454 PF: > { %s1367_s16 = sand.u32 1, %s1797_s21   ;;  %p2529_p4 = scmp.ne.s32.totalorder %s2520_s15, 0 }
 0x455   : > { %p2530_p0 = scmp.ge.s32.totalorder %s1809_s24, 2  ;;  %s1368_s19 = scalar_lea.sflag [#allocation4], %s1367_s16 }
 0x457   : > { %p1529_p2 = pnand %p2530_p0, %p2529_p4 }
 0x459   : > { %p1530_p5 = pneg %p1529_p2 }
 0x45b   : > { %1792 = dma.done.wait (%p1530_p5), %s1368_s19, 256  }
 0x45c   : > { %1794 = vsyncadd (%p1530_p5), %s1368_s19, 4294967040  ;;  %p21_p11 = scmp.ge.s32.totalorder %s1949_s7, 4   ;;  %s2531_s21 = smov %s1801_s22 }
 0x45d   : > { %s2532_s22 = smov %s1805_s23  ;;  %s2533_s23 = smov %s1960_s10 }
 0x45e   : > { %s2534_s24 = smov %s1949_s7  ;;  %23 = sbr.rel (!%p21_p11) target bundleno = 9 (0x9), region = 105 }
 0x463   :  { %1373 = vsyncpa [#allocation3], 1 }
 0x464   :  { %1375 = vsyncpa [#allocation3 + $0x1], 1 }
 0x465   :  { %1376 = vsyncpa [#allocation6], 1 }
 0x466   :  { %1377 = vsyncpa [#allocation9], 1 }
 0x467   :  { %1378 = vsyncpa [#allocation4], 1 }
 0x468   :  { %1380 = vsyncpa [#allocation4 + $0x1], 1 }

</bundles_post_ra>
